<compile_context>
chip_gen: v6e
topology: v6e:2x2x1
jax: 0.10.0
libtpu: 0.0.40
codegen_flags: <defaults>
</compile_context>

<pallas_src>
import jax
import jax.numpy as jnp
from jax.experimental import pallas as pl
from jax.experimental.pallas import tpu as pltpu


def _make_disc_kernel(filter_sizes, num_filters, n_pad):
    """Kernel over one batch tile.

    refs: emb (TB,S,E) bf16, w_big (E,n_pad) bf16, bias (1,n_fs*F) f32,
          fc_w (1,n_fs*F) f32, fc_b (1,1) f32, out (TB,1) f32.
    """
    F = num_filters

    def kernel(emb_ref, w_ref, b_ref, fcw_ref, fcb_ref, out_ref):
        emb = emb_ref[...]                                  # (TB, S, E) bf16
        TB, S, E = emb.shape

        # One lane-dense MXU matmul covering every tap of every filter size.
        y = jnp.dot(emb.reshape(TB * S, E), w_ref[...],
                    preferred_element_type=jnp.float32)     # (TB*S, n_pad) f32
        y = y.reshape(TB, S, n_pad)

        bias = b_ref[...]                                   # (1, n_fs*F) f32
        fcw = fcw_ref[...]                                  # (1, n_fs*F) f32

        logit = jnp.zeros((TB, 1), dtype=jnp.float32)
        off = 0
        for i, fs in enumerate(filter_sizes):
            L = S - fs + 1
            # Valid conv over time == shift+add of the per-tap column blocks.
            acc = y[:, 0:L, off:off + F]
            for k in range(1, fs):
                acc = acc + y[:, k:k + L, off + k * F:off + (k + 1) * F]
            acc = acc + bias[:, i * F:(i + 1) * F][None, :, :]   # conv bias
            acc = jnp.maximum(acc, 0.0)                          # ReLU
            pooled = jnp.max(acc, axis=1)                        # (TB, F) max-pool
            # FC column block on the VPU (cross-lane reduce on XLU).
            logit = logit + jnp.sum(pooled * fcw[:, i * F:(i + 1) * F],
                                    axis=-1, keepdims=True)
            off += fs * F

        logit = logit + fcb_ref[...]
        out_ref[...] = jax.nn.sigmoid(logit)                 # (TB, 1)

    return kernel


def _choose_batch_tile(B, S, E, n_pad, budget_bytes=8 << 20):
    """Largest batch tile whose double-buffered bf16 emb + f32 matmul result
    fit a conservative VMEM budget (safe on v7x's 64 MiB per TC)."""
    per_sample = 2 * S * E * 2 + 2 * S * n_pad * 4   # bf16 emb (x2 buf) + f32 y (x2 slack)
    tb = max(1, budget_bytes // max(per_sample, 1))
    if tb >= B:
        return B                                     # single tile == full array dims
    return max(8, (tb // 8) * 8)                     # keep out-block sublane-aligned


def cnn_discriminator_forward(input_ids, params, filter_sizes, num_filters,
                              batch_tile=None):
    filter_sizes = tuple(filter_sizes)
    n_fs = len(filter_sizes)
    F = num_filters
    B, S = input_ids.shape
    E = params["embedding"].shape[1]
    assert S >= max(filter_sizes), "seq_len must be >= max(filter_sizes)"

    # Fused lane-dense conv weight: columns [off_i + k*F : off_i + (k+1)*F] hold
    # W_i[k] (E, F); padded with zero columns to a multiple of 128.
    w_cols = []
    for i, fs in enumerate(filter_sizes):
        w = params[f"conv{i}_w"]                                     # (fs, E, F)
        w_cols.append(jnp.transpose(w, (1, 0, 2)).reshape(E, fs * F))
    w_big = jnp.concatenate(w_cols, axis=1)                          # (E, T*F)
    n_cols = w_big.shape[1]
    n_pad = ((n_cols + 127) // 128) * 128
    w_big = jnp.pad(w_big, ((0, 0), (0, n_pad - n_cols))).astype(jnp.bfloat16)

    bias = jnp.concatenate([params[f"conv{i}_b"] for i in range(n_fs)],
                           axis=1).astype(jnp.float32)               # (1, n_fs*F)
    fcw = params["fc_w"].reshape(1, n_fs * F).astype(jnp.float32)
    fcb = params["fc_b"].reshape(1, 1).astype(jnp.float32)

    # Embedding gather as JAX glue, but in bf16 to halve HBM bytes of the
    # dominant (B, S, E) activation.
    # TODO(synk): fuse the gather into the kernel (scalar-prefetch row gather /
    # manual DMA) to remove the HBM round-trip of the embedded activations.
    emb = jnp.take(params["embedding"].astype(jnp.bfloat16), input_ids, axis=0)

    if batch_tile is None:
        tb = _choose_batch_tile(B, S, E, n_pad)
    else:
        tb = min(int(batch_tile), B)
        if tb < B:
            tb = max(8, (tb // 8) * 8)
    b_pad = pl.cdiv(B, tb) * tb
    if b_pad != B:
        emb = jnp.pad(emb, ((0, b_pad - B), (0, 0), (0, 0)))

    cost = pl.CostEstimate(
        flops=2 * b_pad * S * E * n_pad + 4 * b_pad * S * n_cols,
        transcendentals=b_pad,
        bytes_accessed=(b_pad * S * E * 2 + E * n_pad * 2
                        + 2 * 4 * n_fs * F + b_pad * 4),
    )

    out = pl.pallas_call(
        _make_disc_kernel(filter_sizes, F, n_pad),
        out_shape=jax.ShapeDtypeStruct((b_pad, 1), jnp.float32),
        grid=(b_pad // tb,),
        in_specs=[
            pl.BlockSpec((tb, S, E), lambda i: (i, 0, 0)),       # emb tile
            pl.BlockSpec((E, n_pad), lambda i: (0, 0)),          # fused conv W
            pl.BlockSpec((1, n_fs * F), lambda i: (0, 0)),       # conv biases
            pl.BlockSpec((1, n_fs * F), lambda i: (0, 0)),       # fc weight (row)
            pl.BlockSpec((1, 1), lambda i: (0, 0)),              # fc bias
        ],
        out_specs=pl.BlockSpec((tb, 1), lambda i: (i, 0)),
        compiler_params=pltpu.CompilerParams(
            dimension_semantics=("parallel",),
            vmem_limit_bytes=32 * 1024 * 1024),
        cost_estimate=cost,
    )(emb, w_big, bias, fcw, fcb)
    return out[:B]


def _reference_forward(input_ids, params, filter_sizes):
    """Pure-JAX f32 reference (PyTorch eval-mode semantics)."""
    emb = jnp.take(params["embedding"], input_ids, axis=0)           # (B,S,E) f32
    pooled = []
    for i, fs in enumerate(filter_sizes):
        w = params[f"conv{i}_w"]                                     # (fs, E, F)
        b = params[f"conv{i}_b"]
        L = emb.shape[1] - fs + 1
        acc = sum(jnp.einsum("ble,ef->blf", emb[:, k:k + L, :], w[k])
                  for k in range(fs)) + b[None, :, :]
        acc = jnp.maximum(acc, 0.0)
        pooled.append(jnp.max(acc, axis=1))
    feats = jnp.concatenate(pooled, axis=-1)
    logits = feats @ params["fc_w"] + params["fc_b"]
    return jax.nn.sigmoid(logits)


def init_params(key, vocab_size, embedding_dim, num_filters, filter_sizes):
    n_keys = 2 * len(filter_sizes) + 3
    keys = jax.random.split(key, n_keys)
    params = {}
    # nn.Embedding default init: N(0, 1)
    params["embedding"] = jax.random.normal(
        keys[0], (vocab_size, embedding_dim), jnp.float32)
    # nn.Conv2d default init: U(-1/sqrt(fan_in), 1/sqrt(fan_in)), fan_in = 1*fs*E
    for i, fs in enumerate(filter_sizes):
        bound = 1.0 / float(fs * embedding_dim) ** 0.5
        params[f"conv{i}_w"] = jax.random.uniform(
            keys[1 + 2 * i], (fs, embedding_dim, num_filters),
            jnp.float32, -bound, bound)
        params[f"conv{i}_b"] = jax.random.uniform(
            keys[2 + 2 * i], (1, num_filters), jnp.float32, -bound, bound)
    fan_in = num_filters * len(filter_sizes)
    bound = 1.0 / float(fan_in) ** 0.5
    params["fc_w"] = jax.random.uniform(
        keys[-2], (fan_in, 1), jnp.float32, -bound, bound)
    params["fc_b"] = jax.random.uniform(
        keys[-1], (1, 1), jnp.float32, -bound, bound)
    return params


if __name__ == "__main__":
    vocab_size, embedding_dim, num_filters = 32, 16, 8
    filter_sizes = (2, 3, 4)

    key = jax.random.PRNGKey(0)
    pkey, ikey, ikey2 = jax.random.split(key, 3)
    params = init_params(pkey, vocab_size, embedding_dim, num_filters, filter_sizes)

    # --- small single-tile case (batch=2, seq=8) ---
    batch, seq = 2, 8
    input_ids = jax.random.randint(ikey, (batch, seq), 0, vocab_size, dtype=jnp.int32)
    out = cnn_discriminator_forward(input_ids, params, filter_sizes, num_filters)
    out = jax.block_until_ready(out)
    assert out.shape == (batch, 1), out.shape
    assert out.dtype == jnp.float32
    assert bool(jnp.all((out >= 0.0) & (out <= 1.0)))
    ref = jax.block_until_ready(_reference_forward(input_ids, params, filter_sizes))
    assert bool(jnp.max(jnp.abs(out - ref)) < 5e-2), jnp.max(jnp.abs(out - ref))

    # --- multi-tile grid + batch-padding path (batch=20, tile=8 -> grid=3) ---
    batch2 = 20
    input_ids2 = jax.random.randint(ikey2, (batch2, seq), 0, vocab_size, dtype=jnp.int32)
    out2 = cnn_discriminator_forward(input_ids2, params, filter_sizes, num_filters,
                                     batch_tile=8)
    out2 = jax.block_until_ready(out2)
    assert out2.shape == (batch2, 1), out2.shape
    ref2 = jax.block_until_ready(_reference_forward(input_ids2, params, filter_sizes))
    assert bool(jnp.max(jnp.abs(out2 - ref2)) < 5e-2), jnp.max(jnp.abs(out2 - ref2))

    print("KERNEL_OK")
</pallas_src>

<mosaic_0001>
module attributes {stable_mosaic.version = 11 : i64} {
  func.func @kernel(%arg0: i32, %arg1: memref<2x8x16xbf16, #tpu.memory_space<vmem>>, %arg2: memref<16x128xbf16, #tpu.memory_space<vmem>>, %arg3: memref<1x24xf32, #tpu.memory_space<vmem>>, %arg4: memref<1x24xf32, #tpu.memory_space<vmem>>, %arg5: memref<1x1xf32, #tpu.memory_space<vmem>>, %arg6: memref<2x1xf32, #tpu.memory_space<vmem>>) attributes {dimension_semantics = [#tpu.dimension_semantics<parallel>], iteration_bounds = array<i64: 1>, scalar_prefetch = 0 : i64, scratch_operands = 0 : i64, tpu.core_type = #tpu.core_type<tc>, window_params = [{transform_indices = @transform_0, window_bounds = array<i64: 2, 8, 16>}, {pipeline_mode = #tpu.pipeline_mode<synchronous>, transform_indices = @transform_1, window_bounds = array<i64: 16, 128>}, {pipeline_mode = #tpu.pipeline_mode<synchronous>, transform_indices = @transform_2, window_bounds = array<i64: 1, 24>}, {pipeline_mode = #tpu.pipeline_mode<synchronous>, transform_indices = @transform_3, window_bounds = array<i64: 1, 24>}, {pipeline_mode = #tpu.pipeline_mode<synchronous>, transform_indices = @transform_4, window_bounds = array<i64: 1, 1>}, {transform_indices = @transform_5, window_bounds = array<i64: 2, 1>}]} {
    %c0 = arith.constant 0 : index
    %c0_0 = arith.constant 0 : index
    %c0_1 = arith.constant 0 : index
    %0 = vector.load %arg1[%c0, %c0_0, %c0_1] : memref<2x8x16xbf16, #tpu.memory_space<vmem>>, vector<2x8x16xbf16>
    %1 = vector.shape_cast %0 : vector<2x8x16xbf16> to vector<16x16xbf16>
    %c0_2 = arith.constant 0 : index
    %c0_3 = arith.constant 0 : index
    %2 = vector.load %arg2[%c0_2, %c0_3] : memref<16x128xbf16, #tpu.memory_space<vmem>>, vector<16x128xbf16>
    %cst = arith.constant dense<0.000000e+00> : vector<16x128xf32>
    %3 = tpu.matmul %1, %2, %cst {dimension_numbers = #tpu.dot_dimension_numbers<[1], [0], [0], [1], [0, 0, 1, 1], [], []>} : vector<16x16xbf16>, vector<16x128xbf16>, vector<16x128xf32> -> vector<16x128xf32>
    %4 = vector.shape_cast %3 : vector<16x128xf32> to vector<2x8x128xf32>
    %c0_4 = arith.constant 0 : index
    %c0_5 = arith.constant 0 : index
    %5 = vector.load %arg3[%c0_4, %c0_5] : memref<1x24xf32, #tpu.memory_space<vmem>>, vector<1x24xf32>
    %c0_6 = arith.constant 0 : index
    %c0_7 = arith.constant 0 : index
    %6 = vector.load %arg4[%c0_6, %c0_7] : memref<1x24xf32, #tpu.memory_space<vmem>>, vector<1x24xf32>
    %cst_8 = arith.constant 0.000000e+00 : f32
    %7 = vector.broadcast %cst_8 : f32 to vector<2x1xf32>
    %8 = vector.extract_strided_slice %4 {offsets = [0, 0, 0], sizes = [2, 7, 8], strides = [1, 1, 1]} : vector<2x8x128xf32> to vector<2x7x8xf32>
    %9 = vector.extract_strided_slice %4 {offsets = [0, 1, 8], sizes = [2, 7, 8], strides = [1, 1, 1]} : vector<2x8x128xf32> to vector<2x7x8xf32>
    %10 = arith.addf %8, %9 : vector<2x7x8xf32>
    %11 = vector.extract_strided_slice %5 {offsets = [0, 0], sizes = [1, 8], strides = [1, 1]} : vector<1x24xf32> to vector<1x8xf32>
    %12 = vector.shape_cast %11 : vector<1x8xf32> to vector<1x1x8xf32>
    %13 = vector.broadcast %12 : vector<1x1x8xf32> to vector<2x7x8xf32>
    %14 = arith.addf %10, %13 : vector<2x7x8xf32>
    %cst_9 = arith.constant 0.000000e+00 : f32
    %15 = vector.broadcast %cst_9 : f32 to vector<2x7x8xf32>
    %16 = arith.maximumf %14, %15 : vector<2x7x8xf32>
    %cst_10 = arith.constant dense<0xFF800000> : vector<2x8xf32>
    %17 = vector.multi_reduction <maximumf>, %16, %cst_10 [1] : vector<2x7x8xf32> to vector<2x8xf32>
    %18 = vector.extract_strided_slice %6 {offsets = [0, 0], sizes = [1, 8], strides = [1, 1]} : vector<1x24xf32> to vector<1x8xf32>
    %19 = vector.broadcast %18 : vector<1x8xf32> to vector<2x8xf32>
    %20 = arith.mulf %17, %19 : vector<2x8xf32>
    %cst_11 = arith.constant dense<0.000000e+00> : vector<2xf32>
    %21 = vector.multi_reduction <add>, %20, %cst_11 [1] : vector<2x8xf32> to vector<2xf32>
    %22 = vector.shape_cast %21 : vector<2xf32> to vector<2x1xf32>
    %23 = arith.addf %7, %22 : vector<2x1xf32>
    %24 = vector.extract_strided_slice %4 {offsets = [0, 0, 16], sizes = [2, 6, 8], strides = [1, 1, 1]} : vector<2x8x128xf32> to vector<2x6x8xf32>
    %25 = vector.extract_strided_slice %4 {offsets = [0, 1, 24], sizes = [2, 6, 8], strides = [1, 1, 1]} : vector<2x8x128xf32> to vector<2x6x8xf32>
    %26 = arith.addf %24, %25 : vector<2x6x8xf32>
    %27 = vector.extract_strided_slice %4 {offsets = [0, 2, 32], sizes = [2, 6, 8], strides = [1, 1, 1]} : vector<2x8x128xf32> to vector<2x6x8xf32>
    %28 = arith.addf %26, %27 : vector<2x6x8xf32>
    %29 = vector.extract_strided_slice %5 {offsets = [0, 8], sizes = [1, 8], strides = [1, 1]} : vector<1x24xf32> to vector<1x8xf32>
    %30 = vector.shape_cast %29 : vector<1x8xf32> to vector<1x1x8xf32>
    %31 = vector.broadcast %30 : vector<1x1x8xf32> to vector<2x6x8xf32>
    %32 = arith.addf %28, %31 : vector<2x6x8xf32>
    %cst_12 = arith.constant 0.000000e+00 : f32
    %33 = vector.broadcast %cst_12 : f32 to vector<2x6x8xf32>
    %34 = arith.maximumf %32, %33 : vector<2x6x8xf32>
    %cst_13 = arith.constant dense<0xFF800000> : vector<2x8xf32>
    %35 = vector.multi_reduction <maximumf>, %34, %cst_13 [1] : vector<2x6x8xf32> to vector<2x8xf32>
    %36 = vector.extract_strided_slice %6 {offsets = [0, 8], sizes = [1, 8], strides = [1, 1]} : vector<1x24xf32> to vector<1x8xf32>
    %37 = vector.broadcast %36 : vector<1x8xf32> to vector<2x8xf32>
    %38 = arith.mulf %35, %37 : vector<2x8xf32>
    %cst_14 = arith.constant dense<0.000000e+00> : vector<2xf32>
    %39 = vector.multi_reduction <add>, %38, %cst_14 [1] : vector<2x8xf32> to vector<2xf32>
    %40 = vector.shape_cast %39 : vector<2xf32> to vector<2x1xf32>
    %41 = arith.addf %23, %40 : vector<2x1xf32>
    %42 = vector.extract_strided_slice %4 {offsets = [0, 0, 40], sizes = [2, 5, 8], strides = [1, 1, 1]} : vector<2x8x128xf32> to vector<2x5x8xf32>
    %43 = vector.extract_strided_slice %4 {offsets = [0, 1, 48], sizes = [2, 5, 8], strides = [1, 1, 1]} : vector<2x8x128xf32> to vector<2x5x8xf32>
    %44 = arith.addf %42, %43 : vector<2x5x8xf32>
    %45 = vector.extract_strided_slice %4 {offsets = [0, 2, 56], sizes = [2, 5, 8], strides = [1, 1, 1]} : vector<2x8x128xf32> to vector<2x5x8xf32>
    %46 = arith.addf %44, %45 : vector<2x5x8xf32>
    %47 = vector.extract_strided_slice %4 {offsets = [0, 3, 64], sizes = [2, 5, 8], strides = [1, 1, 1]} : vector<2x8x128xf32> to vector<2x5x8xf32>
    %48 = arith.addf %46, %47 : vector<2x5x8xf32>
    %49 = vector.extract_strided_slice %5 {offsets = [0, 16], sizes = [1, 8], strides = [1, 1]} : vector<1x24xf32> to vector<1x8xf32>
    %50 = vector.shape_cast %49 : vector<1x8xf32> to vector<1x1x8xf32>
    %51 = vector.broadcast %50 : vector<1x1x8xf32> to vector<2x5x8xf32>
    %52 = arith.addf %48, %51 : vector<2x5x8xf32>
    %cst_15 = arith.constant 0.000000e+00 : f32
    %53 = vector.broadcast %cst_15 : f32 to vector<2x5x8xf32>
    %54 = arith.maximumf %52, %53 : vector<2x5x8xf32>
    %cst_16 = arith.constant dense<0xFF800000> : vector<2x8xf32>
    %55 = vector.multi_reduction <maximumf>, %54, %cst_16 [1] : vector<2x5x8xf32> to vector<2x8xf32>
    %56 = vector.extract_strided_slice %6 {offsets = [0, 16], sizes = [1, 8], strides = [1, 1]} : vector<1x24xf32> to vector<1x8xf32>
    %57 = vector.broadcast %56 : vector<1x8xf32> to vector<2x8xf32>
    %58 = arith.mulf %55, %57 : vector<2x8xf32>
    %cst_17 = arith.constant dense<0.000000e+00> : vector<2xf32>
    %59 = vector.multi_reduction <add>, %58, %cst_17 [1] : vector<2x8xf32> to vector<2xf32>
    %60 = vector.shape_cast %59 : vector<2xf32> to vector<2x1xf32>
    %61 = arith.addf %41, %60 : vector<2x1xf32>
    %c0_18 = arith.constant 0 : index
    %c0_19 = arith.constant 0 : index
    %62 = vector.load %arg5[%c0_18, %c0_19] : memref<1x1xf32, #tpu.memory_space<vmem>>, vector<1x1xf32>
    %63 = vector.broadcast %62 : vector<1x1xf32> to vector<2x1xf32>
    %64 = arith.addf %61, %63 : vector<2x1xf32>
    %65 = arith.negf %64 : vector<2x1xf32>
    %66 = math.exp %65 : vector<2x1xf32>
    %cst_20 = arith.constant 1.000000e+00 : f32
    %67 = vector.broadcast %cst_20 : f32 to vector<2x1xf32>
    %68 = arith.addf %67, %66 : vector<2x1xf32>
    %69 = arith.divf %67, %68 : vector<2x1xf32>
    %c0_21 = arith.constant 0 : index
    %c0_22 = arith.constant 0 : index
    %70 = vector.load %arg6[%c0_21, %c0_22] : memref<2x1xf32, #tpu.memory_space<vmem>>, vector<2x1xf32>
    tpu.vector_store %arg6[%c0_21, %c0_22], %69 {strides = array<i32>} : memref<2x1xf32, #tpu.memory_space<vmem>>, vector<2x1xf32>,
    return
  }
  func.func @transform_0(%arg0: i32) -> (i32, i32, i32) {
    %c0_i32 = arith.constant 0 : i32
    %c0_i32_0 = arith.constant 0 : i32
    %c0_i32_1 = arith.constant 0 : i32
    return %arg0, %c0_i32, %c0_i32_0 : i32, i32, i32
  }
  func.func @transform_1(%arg0: i32) -> (i32, i32) {
    %c0_i32 = arith.constant 0 : i32
    %c0_i32_0 = arith.constant 0 : i32
    %c0_i32_1 = arith.constant 0 : i32
    return %c0_i32, %c0_i32_0 : i32, i32
  }
  func.func @transform_2(%arg0: i32) -> (i32, i32) {
    %c0_i32 = arith.constant 0 : i32
    %c0_i32_0 = arith.constant 0 : i32
    %c0_i32_1 = arith.constant 0 : i32
    return %c0_i32, %c0_i32_0 : i32, i32
  }
  func.func @transform_3(%arg0: i32) -> (i32, i32) {
    %c0_i32 = arith.constant 0 : i32
    %c0_i32_0 = arith.constant 0 : i32
    %c0_i32_1 = arith.constant 0 : i32
    return %c0_i32, %c0_i32_0 : i32, i32
  }
  func.func @transform_4(%arg0: i32) -> (i32, i32) {
    %c0_i32 = arith.constant 0 : i32
    %c0_i32_0 = arith.constant 0 : i32
    %c0_i32_1 = arith.constant 0 : i32
    return %c0_i32, %c0_i32_0 : i32, i32
  }
  func.func @transform_5(%arg0: i32) -> (i32, i32) {
    %c0_i32 = arith.constant 0 : i32
    %c0_i32_0 = arith.constant 0 : i32
    return %arg0, %c0_i32 : i32, i32
  }
}

</mosaic_0001>

<bundles_post_ra>
// kernel: tpu_custom_call.1
= control target key start
LH: loop header
LB: loop body
LE: loop exit
PB: predicated region body
PF: predicated region fallthrough
CT: control target
= control target key end

     0   :  { %s438_s0 = inlined_call_operand.hbm [shape: bf16[2,8,16], index: 0, kind: input, shape index: {}]   ;;  %s439_s1 = inlined_call_operand.hbm [shape: bf16[16,128], index: 1, kind: input, shape index: {}]   ;;  %s440_s2 = inlined_call_operand.vmem [shape: f32[1,24], index: 2, kind: input, shape index: {}]   ;;  %s441_s3 = inlined_call_operand.vmem [shape: f32[1,24], index: 3, kind: input, shape index: {}]   ;;  %s442_s4 = inlined_call_operand.<no memory space> [shape: f32[1,1], index: 4, kind: input, shape index: {}]   ;;  %s443_s5 = inlined_call_operand.vmem [shape: f32[2,1], index: 5, kind: output, shape index: {}]  }
   0x1   :  { %v10_v0 = vstv %s442_s4 }
   0x2   :  { %11 = vst [vmem:[#allocation2] sm:$0x1] %v10_v0 }
   0x3   :  { %12 = vsyncpa [#allocation4], 0 }
   0x4   :  { %13 = vsyncpa [#allocation6], 0  ;;  %s364_s20 = smov [#allocation3]  }
   0x5   :  { %s19_s21 = sshll.u32 %s364_s20, 4  ;;  %s20_s21 = int_to_ptr.vmem [resolvable:$true] %s19_s21 }
   0x6   :  { %s328_s22 = scalar_lea.vmem %s20_s21, 128  ;;  %p333_p1 = scmp.lt.s32.totalorder %s20_s21, %s20_s21 }
   0x7   :  { %p329_p0 = scmp.ne.s32.totalorder %s20_s21, %s328_s22  ;;  %p334_p2 = scmp.lt.s32.totalorder %s328_s22, %s328_s22 }
   0x9   :  { %p335_p3 = por %p334_p2, %p333_p1 }
   0xb   :  { %p336_p4 = pnand %p335_p3, %p329_p0 }
   0xd   :  { %339 = shalt.err (!%p336_p4)
}
   0xe   :  { %s365_s23 = smov 64   ;;  %s366_s24 = smov 4  }
   0xf   :  { %25 = dma.hbm_to_vmem [thread:$0]  %s438_s0, 128, %s20_s21, [#allocation4], %s365_s23, %s365_s23, %s366_s24  }
  0x10   :  { %s367_s4 = smov [#allocation5]  }
  0x11   :  { %s31_s27 = sshll.u32 %s367_s4, 4  ;;  %s32_s27 = int_to_ptr.vmem [resolvable:$true] %s31_s27 }
  0x12   :  { %s348_s28 = scalar_lea.vmem %s32_s27, 128  ;;  %p353_p6 = scmp.lt.s32.totalorder %s32_s27, %s32_s27 }
  0x13   :  { %p349_p5 = scmp.ne.s32.totalorder %s32_s27, %s348_s28  ;;  %p354_p7 = scmp.lt.s32.totalorder %s348_s28, %s348_s28 }
  0x15   :  { %p355_p8 = por %p354_p7, %p353_p6 }
  0x17   :  { %p356_p9 = pnand %p355_p8, %p349_p5 }
  0x19   :  { %359 = shalt.err (!%p356_p9)
}
  0x1a   :  { %37 = dma.hbm_to_vmem [thread:$0]  %s439_s1, 128, %s32_s27, [#allocation6], %s365_s23, %s365_s23, %s366_s24  }
  0x1b   :  { %360 = dma.done.wait [#allocation4], 128  }
  0x1c   :  { %361 = vsyncadd [#allocation4], 4294967168 }
  0x1d   :  { %362 = dma.done.wait [#allocation6], 128  }
  0x1e   :  { %363 = vsyncadd [#allocation6], 4294967168  ;;  %v368_v1 = vmov 0.0   ;;  %vm369_vm0 = vmmov 0   ;;  %v314_v2 = vld [vmem:[#allocation5] sm:$0xff]   ;;  %v315_v3 = vld [vmem:[#allocation3] sm:$0xff]  }
  0x1f   :  { %296 = vmatprep.subr.bf16.mxu0 %v368_v1  ;;  %298 = vmatprep.mubr.msk.bf16.mxu0 %vm369_vm0, %v368_v1  ;;  %vm66_vm1 = vcmask 130048   ;;  %s370_s0 = smov 112   ;;  %s371_s1 = smov 120   ;;  %v290_v12 = vld [vmem:[%s440_s2] ss:$0 sm:$0xff]  ;;  %vm186_vm2 = vcmask 193664  }
  0x20   :  { %297 = vmatpush3.bf16.msra.mxu0 %v314_v2  ;;  %s372_s8 = smov 104   ;;  %s373_s9 = smov 8   ;;  %v423_v15 = vld [vmem:[%s441_s3] ss:$0 sm:$0xff]  ;;  %vm234_vm3 = vcmask 389440   ;;  %vm135_vm4 = vcmask 63488  }
  0x21   :  { %s374_s10 = smov 24   ;;  %vm161_vm5 = vcmask 1041409   ;;  %s375_s2 = smov 88   ;;  %vm164_vm6 = vcmask 58368   ;;  %vm279_vm7 = vcmask 1024  }
  0x23   :  { %299 = vmatmul.mubr.msk.bf16.vlgmr.msra.gmra.mxu0 %vm66_vm1, %v315_v3 }
  0xe3   :  { %v104_v4 = vpop.f32.mrf.mxu0 }
  0xe4   :  { %v169_v5 = vrot.slane %v104_v4, 2  ;;  %v115_v6 = vrot.slane %v104_v4, 1  ;;  %v217_v14 = vrot.slane %v104_v4, 3 }
  0xe5   :  { %v300_v7 = vpop.f32.mrf.mxu0 }
  0xe6   :  { %171 = vrot.lane.b32.xlu1 %v169_v5, %s370_s0  ;;  %117 = vrot.lane.b32.xlu0 %v115_v6, %s371_s1 }
  0xe7   :  { %v107_v8 = vpop.f32.mrf.mxu0 }
  0xe8   :  { %v170_v9 = vrot.slane %v107_v8, 2  ;;  %v116_v10 = vrot.slane %v107_v8, 1  ;;  %v218_v13 = vrot.slane %v107_v8, 3 }
  0xe9   :  { %v301_v11 = vpop.f32.mrf.mxu0 }
  0xea   :  { %173 = vrot.lane.b32.xlu1 %v170_v9, %s370_s0  ;;  %119 = vrot.lane.b32.xlu0 %v116_v10, %s371_s1 }
  0xee   :  { %221 = vrot.lane.b32.xlu1 %v218_v13, %s372_s8  ;;  %179 = vrot.lane.b32.xlu0 %v290_v12, %s373_s9 }
  0xf2   :  { %227 = vrot.lane.b32.xlu1 %v290_v12, %s374_s10  ;;  %219 = vrot.lane.b32.xlu0 %v217_v14, %s372_s8 }
  0xf6   :  { %201 = vrot.lane.b32.xlu0 %v423_v15, %s373_s9  ;;  %249 = vrot.lane.b32.xlu1 %v423_v15, %s374_s10 }
 0x158   :  { %v172_v16 = vpop.permute.xlu1 %171  ;;  %v118_v17 = vpop.permute.xlu0 %117 }
 0x159   :  { %v123_v18 = vadd.f32 %v118_v17, %v104_v4 }
 0x15b   :  { %v177_v22 = vadd.f32 %v172_v16, %v123_v18  ;;  %v131_v55 = vadd.f32 %v290_v12, %v123_v18 }
 0x15c   :  { %v174_v19 = vpop.permute.xlu1 %173  ;;  %v120_v20 = vpop.permute.xlu0 %119 }
 0x15d   :  { %v124_v21 = vadd.f32 %v120_v20, %v107_v8  ;;  %v133_v2 = vmax.f32 %v131_v55, 0.0 }
 0x15f   :  { %v178_v23 = vadd.f32 %v174_v19, %v124_v21  ;;  %v132_v41 = vadd.f32 %v290_v12, %v124_v21  ;;  %v136_v12 = vsel %vm135_vm4, %v133_v2, -inf }
 0x160   :  { %v222_v24 = vpop.permute.xlu1 %221  ;;  %v180_v25 = vpop.permute.xlu0 %179  ;;  %v137_v20 = vrot.slane %v136_v12, 4 }
 0x161   :  { %v182_v26 = vadd.f32 %v180_v25, %v177_v22  ;;  %v183_v27 = vadd.f32 %v180_v25, %v178_v23  ;;  %v226_v28 = vadd.f32 %v222_v24, %v178_v23  ;;  %v134_v50 = vmax.f32 %v132_v41, 0.0 }
 0x162   :  { %v138_v23 = vmax.f32 %v136_v12, %v137_v20 }
 0x163   :  { %v184_v29 = vmax.f32 %v182_v26, 0.0  ;;  %v185_v30 = vmax.f32 %v183_v27, 0.0  ;;  %v143_v60 = vsel %vm135_vm4, %v134_v50, -inf }
 0x164   :  { %v228_v31 = vpop.permute.xlu1 %227  ;;  %v220_v32 = vpop.permute.xlu0 %219  ;;  %v144_v5 = vrot.slane %v143_v60, 4  ;;  %v139_v25 = vrot.slane %v138_v23, 2 }
 0x165   :  { %v187_v33 = vsel %vm186_vm2, %v184_v29, -inf  ;;  %v194_v34 = vsel %vm186_vm2, %v185_v30, -inf  ;;  %v231_v35 = vadd.f32 %v228_v31, %v226_v28  ;;  %v225_v36 = vadd.f32 %v220_v32, %v177_v22 }
 0x166   :  { %v188_v37 = vrot.slane %v187_v33, 4  ;;  %v195_v38 = vrot.slane %v194_v34, 4  ;;  %v145_v16 = vmax.f32 %v143_v60, %v144_v5  ;;  %v140_v27 = vmax.f32 %v138_v23, %v139_v25 }
 0x167   :  { %v233_v39 = vmax.f32 %v231_v35, 0.0  ;;  %v230_v40 = vadd.f32 %v228_v31, %v225_v36 }
 0x168   :  { %v189_v42 = vmax.f32 %v187_v33, %v188_v37  ;;  %v196_v43 = vmax.f32 %v194_v34, %v195_v38  ;;  %v202_v61 = vpop.permute.xlu0 %201  ;;  %v250_v7 = vpop.permute.xlu1 %249  ;;  %v146_v22 = vrot.slane %v145_v16, 2  ;;  %v141_v29 = vrot.slane %v140_v27, 1 }
 0x169   :  { %v242_v44 = vsel %vm234_vm3, %v233_v39, -inf  ;;  %v232_v45 = vmax.f32 %v230_v40, 0.0 }
 0x16a   :  { %v190_v46 = vrot.slane %v189_v42, 2  ;;  %v197_v47 = vrot.slane %v196_v43, 2  ;;  %v243_v48 = vrot.slane %v242_v44, 4  ;;  %v147_v24 = vmax.f32 %v145_v16, %v146_v22 }
 0x16b   :  { %v235_v49 = vsel %vm234_vm3, %v232_v45, -inf  ;;  %v142_v31 = vmax.f32 %v140_v27, %v141_v29 }
 0x16c   :  { %v244_v51 = vmax.f32 %v242_v44, %v243_v48  ;;  %v236_v52 = vrot.slane %v235_v49, 4  ;;  %v191_v53 = vmax.f32 %v189_v42, %v190_v46  ;;  %v198_v54 = vmax.f32 %v196_v43, %v197_v47  ;;  %v292_v43 = vld [vmem:[#allocation2] ss:$0 sm:$0xff] }
 0x16d   :  { %v148_v26 = vrot.slane %v147_v24, 1  ;;  %v156_v33 = vmul.f32 %v423_v15, %v142_v31 }
 0x16e   :  { %v245_v56 = vrot.slane %v244_v51, 2  ;;  %v237_v57 = vmax.f32 %v235_v49, %v236_v52  ;;  %v192_v58 = vrot.slane %v191_v53, 1  ;;  %v199_v59 = vrot.slane %v198_v54, 1 }
 0x16f   :  { %v149_v28 = vmax.f32 %v147_v24, %v148_v26 }
 0x170   :  { %v238_v62 = vrot.slane %v237_v57, 2  ;;  %v246_v63 = vmax.f32 %v244_v51, %v245_v56  ;;  %v193_v0 = vmax.f32 %v191_v53, %v192_v58  ;;  %v200_v1 = vmax.f32 %v198_v54, %v199_v59 }
 0x171   :  { %v157_v30 = vmul.f32 %v423_v15, %v149_v28 }
 0x172   :  { %v239_v3 = vmax.f32 %v237_v57, %v238_v62  ;;  %v247_v4 = vrot.slane %v246_v63, 1  ;;  %v205_v6 = vmul.f32 %v202_v61, %v200_v1  ;;  %v204_v10 = vmul.f32 %v202_v61, %v193_v0 }
 0x173   :  { %v160_v32 = vrot.slane %v157_v30, 7 }
 0x174   :  { %v240_v8 = vrot.slane %v239_v3, 1  ;;  %v248_v9 = vmax.f32 %v246_v63, %v247_v4  ;;  %v208_v11 = vrot.slane %v205_v6, 7 }
 0x175   :  { %v162_v34 = vsel %vm161_vm5, %v160_v32, %v156_v33 }
 0x176   :  { %v241_v13 = vmax.f32 %v239_v3, %v240_v8  ;;  %v253_v14 = vmul.f32 %v250_v7, %v248_v9  ;;  %v209_v17 = vsel %vm161_vm5, %v208_v11, %v204_v10  ;;  %v165_v35 = vsel %vm164_vm6, %v162_v34, 0.0 }
 0x177   :  { %210 = vrot.lane.b32.xlu0 %v209_v17, %s370_s0 }
 0x178   :  { %v252_v18 = vmul.f32 %v250_v7, %v241_v13  ;;  %v256_v19 = vrot.slane %v253_v14, 7 }
 0x17a   :  { %v257_v21 = vsel %vm161_vm5, %v256_v19, %v252_v18 }
 0x17b   :  { %258 = vrot.lane.b32.xlu1 %v257_v21, %s375_s2 }
 0x196   :  { %166 = vadd.xlane.f32.xlu0 %v165_v35 }
 0x1e9   :  { %v211_v36 = vpop.permute.xlu0 %210 }
 0x1ea   :  { %v213_v37 = vsel %vm164_vm6, %v211_v36, 0.0 }
 0x1eb   :  { %214 = vadd.xlane.f32.xlu1 %v213_v37 }
 0x1ed   :  { %v259_v38 = vpop.permute.xlu1 %258 }
 0x1ee   :  { %v261_v39 = vsel %vm164_vm6, %v259_v38, 0.0 }
 0x1ef   :  { %262 = vadd.xlane.f32.xlu0 %v261_v39 }
 0x21f   :  { %v167_v40 = vpop.xlane.xlu0 %166 }
 0x274   :  { %v215_v41 = vpop.xlane.xlu1 %214 }
 0x275   :  { %v216_v42 = vadd.f32 %v215_v41, %v167_v40 }
 0x278   :  { %v263_v44 = vpop.xlane.xlu0 %262 }
 0x279   :  { %v264_v45 = vadd.f32 %v263_v44, %v216_v42 }
 0x27b   :  { %v272_v46 = vadd.f32 %v292_v43, %v264_v45 }
 0x27d   :  { %v293_v47 = vmul.f32 -1.442695, %v272_v46 }
 0x27f   :  { %316 = vpow2.f32 %v293_v47 }
 0x28c   :  { %v317_v15 = vpop.eup %316 }
 0x28d   :  { %v276_v48 = vadd.f32 1.0, %v317_v15 }
 0x28f   :  { %318 = vrcp.f32 %v276_v48 }
 0x29c   :  { %v319_v49 = vpop.eup %318 }
 0x29d   :  { %280 = vst.msk [vmem:[%s443_s5] sm:$0x3] %vm279_vm7, %v319_v49 }
 0x29e   :  { %285 = vsyncpa [#allocation4], 1 }
 0x29f   :  { %286 = vsyncpa [#allocation6], 1 }

</bundles_post_ra>
